<compile_context>
chip_gen: v5e
topology: v5e:2x2
jax: 0.10.0
libtpu: 0.0.40
codegen_flags: <defaults>
</compile_context>

<pallas_src>
import jax
import jax.numpy as jnp
from jax.experimental import pallas as pl
from jax.experimental.pallas import tpu as pltpu


def _round_up(x, m):
    return (x + m - 1) // m * m


def word2vec_kernel(x_ref, wt_ref, b_ref, out_ref):
    # x_ref  : (tn, E_pad)  bf16  gathered embedding rows for this token tile
    # wt_ref : (E_pad, tv)  bf16  tile of W^T
    # b_ref  : (1, tv)      f32   tile of bias
    # out_ref: (tn, tv)     f32   logits tile
    out_ref[...] = (
        jnp.dot(x_ref[...], wt_ref[...], preferred_element_type=jnp.float32)
        + b_ref[...]
    )


def word2vec_forward(x, emb_table, w, b, *, tn=256, tv=1024):
    """x: (B, S) int token ids. Returns (B, S, V) float32 logits."""
    B, S = x.shape
    V, E = emb_table.shape
    N = B * S

    # ---- tile sizes -------------------------------------------------------
    # Token tile: multiple of 8 (sublane). Keep >=2 token tiles when possible
    # so the "parallel" token axis can shard across TensorCores (v7x megacore).
    tn = min(tn, _round_up(N, 8))
    n_pad = _round_up(N, tn)
    if n_pad // tn < 2 and N > 8:
        tn = _round_up((n_pad + 1) // 2, 8)
        n_pad = _round_up(N, tn)

    # Vocab tile: largest multiple of 128 <= tv that divides round_up(V, 128),
    # so v_pad == round_up(V, 128) (and == V when V % 128 == 0 -> no slice).
    v128 = _round_up(V, 128)
    d = v128 // 128
    best = 1
    for m in range(1, min(tv // 128, d) + 1):
        if d % m == 0:
            best = m
    tv = 128 * best
    v_pad = v128

    # Contraction dim: pad E to a multiple of 128 (lane-dense activations,
    # clean MXU contraction). Zero padding does not change the result.
    e_pad = _round_up(E, 128)

    # ---- operand prep (wrapper-side) --------------------------------------
    ids = jnp.zeros((n_pad,), jnp.int32).at[:N].set(x.reshape(N).astype(jnp.int32))
    emb_bf16 = jnp.zeros((V, e_pad), jnp.bfloat16).at[:, :E].set(
        emb_table.astype(jnp.bfloat16)
    )
    # Embedding gather happens here; the result is pipelined into the kernel
    # as a normal input (auto double-buffered behind the previous tile's dot).
    x_gather = jnp.take(emb_bf16, ids, axis=0)                # (n_pad, e_pad) bf16
    # Pre-transpose W to (E, V): the kernel never does an in-kernel transpose,
    # and every output block is a full-lane (unmasked) store.
    w_t = jnp.zeros((e_pad, v_pad), jnp.bfloat16).at[:E, :V].set(
        jnp.transpose(w).astype(jnp.bfloat16)
    )
    b2d = jnp.zeros((1, v_pad), jnp.float32).at[:, :V].set(
        b.reshape(1, V).astype(jnp.float32)
    )

    grid = (n_pad // tn, v_pad // tv)

    # VMEM: double-buffered x / W^T / bias / out tiles + headroom; cap at
    # 48 MiB so the budget also fits v7x's 64 MiB per-core VMEM.
    block_bytes = 2 * tn * e_pad + 2 * e_pad * tv + 4 * tv + 4 * tn * tv
    vmem_limit = int(min(48 * 2**20, max(16 * 2**20, 2 * block_bytes + (2 << 20))))

    cost = pl.CostEstimate(
        flops=2 * n_pad * e_pad * v_pad,
        transcendentals=0,
        bytes_accessed=(
            2 * n_pad * e_pad                       # gathered activations (read once per i)
            + 2 * (n_pad // tn) * e_pad * v_pad     # W^T re-streamed per token tile
            + 4 * (n_pad // tn) * v_pad             # bias tile per token tile
            + 4 * n_pad * v_pad                     # logits write
        ),
    )

    out = pl.pallas_call(
        word2vec_kernel,
        out_shape=jax.ShapeDtypeStruct((n_pad, v_pad), jnp.float32),
        grid_spec=pltpu.PrefetchScalarGridSpec(
            num_scalar_prefetch=0,
            grid=grid,
            in_specs=[
                pl.BlockSpec((tn, e_pad), lambda i, j: (i, 0)),   # activations
                pl.BlockSpec((e_pad, tv), lambda i, j: (0, j)),   # W^T tile
                pl.BlockSpec((1, tv), lambda i, j: (0, j)),       # bias tile
            ],
            out_specs=pl.BlockSpec((tn, tv), lambda i, j: (i, j)),
        ),
        compiler_params=pltpu.CompilerParams(
            dimension_semantics=("parallel", "parallel"),
            vmem_limit_bytes=vmem_limit,
        ),
        cost_estimate=cost,
    )(x_gather, w_t, b2d)

    # Slice only the axes that actually carry padding (avoids a full extra
    # read+write of the logits when V % 128 == 0 and N % tn == 0).
    if v_pad != V:
        out = out[:, :V]
    if n_pad != N:
        out = out[:N]
    return out.reshape(B, S, V)


if __name__ == "__main__":
    # Small, deterministic setup consistent with Word2Vec(vocab_size, emb_size).
    vocab_size = 64
    emb_size = 32
    batch, seq = 2, 8

    key = jax.random.PRNGKey(0)
    k_ids, k_emb, k_w, k_b = jax.random.split(key, 4)

    x = jax.random.randint(k_ids, (batch, seq), 0, vocab_size, dtype=jnp.int32)
    emb_table = jax.random.normal(k_emb, (vocab_size, emb_size), dtype=jnp.float32)
    w = jax.random.normal(k_w, (vocab_size, emb_size), dtype=jnp.float32) * 0.1
    b = jax.random.normal(k_b, (vocab_size,), dtype=jnp.float32) * 0.1

    out = word2vec_forward(x, emb_table, w, b)
    out = jax.block_until_ready(out)

    # Pure-JAX f32 reference (embedding gather + linear). The kernel uses bf16
    # weights/activations with f32 accumulation, so tolerances are loosened.
    ref = jnp.take(emb_table, x, axis=0) @ w.T + b
    assert out.shape == (batch, seq, vocab_size)
    assert jnp.allclose(out, ref, atol=2e-2, rtol=2e-2)

    print("KERNEL_OK")
</pallas_src>

<mosaic_0001>
module attributes {stable_mosaic.version = 11 : i64} {
  func.func @word2vec_kernel(%arg0: i32, %arg1: i32, %arg2: memref<8x128xbf16, #tpu.memory_space<vmem>>, %arg3: memref<128x128xbf16, #tpu.memory_space<vmem>>, %arg4: memref<1x128xf32, #tpu.memory_space<vmem>>, %arg5: memref<8x128xf32, #tpu.memory_space<vmem>>) attributes {dimension_semantics = [#tpu.dimension_semantics<parallel>, #tpu.dimension_semantics<parallel>], iteration_bounds = array<i64: 2, 1>, scalar_prefetch = 0 : i64, scratch_operands = 0 : i64, tpu.core_type = #tpu.core_type<tc>, window_params = [{transform_indices = @transform_0, window_bounds = array<i64: 8, 128>}, {transform_indices = @transform_1, window_bounds = array<i64: 128, 128>}, {transform_indices = @transform_2, window_bounds = array<i64: 1, 128>}, {transform_indices = @transform_3, window_bounds = array<i64: 8, 128>}]} {
    %c0 = arith.constant 0 : index
    %c0_0 = arith.constant 0 : index
    %0 = vector.load %arg2[%c0, %c0_0] : memref<8x128xbf16, #tpu.memory_space<vmem>>, vector<8x128xbf16>
    %c0_1 = arith.constant 0 : index
    %c0_2 = arith.constant 0 : index
    %1 = vector.load %arg3[%c0_1, %c0_2] : memref<128x128xbf16, #tpu.memory_space<vmem>>, vector<128x128xbf16>
    %cst = arith.constant dense<0.000000e+00> : vector<8x128xf32>
    %2 = tpu.matmul %0, %1, %cst {dimension_numbers = #tpu.dot_dimension_numbers<[1], [0], [0], [1], [0, 0, 1, 1], [], []>} : vector<8x128xbf16>, vector<128x128xbf16>, vector<8x128xf32> -> vector<8x128xf32>
    %c0_3 = arith.constant 0 : index
    %c0_4 = arith.constant 0 : index
    %3 = vector.load %arg4[%c0_3, %c0_4] : memref<1x128xf32, #tpu.memory_space<vmem>>, vector<1x128xf32>
    %4 = vector.broadcast %3 : vector<1x128xf32> to vector<8x128xf32>
    %5 = arith.addf %2, %4 : vector<8x128xf32>
    %c0_5 = arith.constant 0 : index
    %c0_6 = arith.constant 0 : index
    %6 = vector.load %arg5[%c0_5, %c0_6] : memref<8x128xf32, #tpu.memory_space<vmem>>, vector<8x128xf32>
    tpu.vector_store %arg5[%c0_5, %c0_6], %5 {strides = array<i32>} : memref<8x128xf32, #tpu.memory_space<vmem>>, vector<8x128xf32>,
    return
  }
  func.func @transform_0(%arg0: i32, %arg1: i32) -> (i32, i32) {
    %c0_i32 = arith.constant 0 : i32
    %c0_i32_0 = arith.constant 0 : i32
    return %arg0, %c0_i32 : i32, i32
  }
  func.func @transform_1(%arg0: i32, %arg1: i32) -> (i32, i32) {
    %c0_i32 = arith.constant 0 : i32
    %c0_i32_0 = arith.constant 0 : i32
    return %c0_i32, %arg1 : i32, i32
  }
  func.func @transform_2(%arg0: i32, %arg1: i32) -> (i32, i32) {
    %c0_i32 = arith.constant 0 : i32
    %c0_i32_0 = arith.constant 0 : i32
    return %c0_i32, %arg1 : i32, i32
  }
  func.func @transform_3(%arg0: i32, %arg1: i32) -> (i32, i32) {
    %c0_i32 = arith.constant 0 : i32
    return %arg0, %arg1 : i32, i32
  }
}

</mosaic_0001>

<bundles_post_ra>
// kernel: tpu_custom_call.1
= control target key start
LH: loop header
LB: loop body
LE: loop exit
PB: predicated region body
PF: predicated region fallthrough
CT: control target
= control target key end

     0   :  { %8 = vsyncpa [#allocation3], 0  ;;  %s893_s0 = inlined_call_operand.hbm [shape: bf16[16,128], index: 0, kind: input, shape index: {}]   ;;  %s894_s1 = inlined_call_operand.hbm [shape: bf16[128,128], index: 1, kind: input, shape index: {}]   ;;  %s895_s2 = inlined_call_operand.vmem [shape: f32[1,128], index: 2, kind: input, shape index: {}]   ;;  %s896_s3 = inlined_call_operand.hbm [shape: f32[16,128], index: 3, kind: output, shape index: {}]  }
   0x1   :  { %10 = vsyncpa [#allocation3 + $0x1], 0 }
   0x2   :  { %11 = vsyncpa [#allocation6], 0 }
   0x3   :  { %12 = vsyncpa [#allocation4], 0 }
   0x4   :  { %14 = vsyncpa [#allocation4 + $0x1], 0  ;;  %s746_s12 = smov 0   ;;  %s748_s13 = smov 0  }
   0x5   :  { %s750_s14 = smov 0   ;;  %s752_s15 = smov 0  }
   0x6   :  { %s754_s16 = smov 0   ;;  %s756_s17 = smov 0  }
   0x7 LB: > { %s443_s18 = sadd.s32 4294967295, %s721_s17   ;;  %p445_p0 = scmp.ge.s32.totalorder %s721_s17, 1  ;;  %s721_s17 = sphi %s756_s17, %s20_s17   ;;  %s717_s16 = sphi %s754_s16, %s907_s16   ;;  %s713_s15 = sphi %s752_s15, %s906_s15   ;;  %s709_s14 = sphi %s750_s14, %s905_s14   ;;  %s705_s13 = sphi %s748_s13, %s904_s13   ;;  %s701_s12 = sphi %s746_s12, %s903_s12  }
   0x8   : > { %p778_p1 = scmp.eq.s32.totalorder %s443_s18, 0  ;;  %p143_p2 = scmp.lt.s32.totalorder %s721_s17, 3 }
   0x9   : > { %s156_s22 = sshll.u32 %s894_s1, 4  ;;  %s723_s24 = smov [#allocation5]   ;;  %s157_s22 = int_to_ptr.hbm [resolvable:$true] %s156_s22 }
   0xa   : > { %p786_p3 = pnand %p445_p0, %p143_p2  ;;  %s158_s25 = sshll.u32 %s723_s24, 4  ;;  %s159_s25 = int_to_ptr.vmem [resolvable:$true] %s158_s25 }
   0xb   : > { %p448_p6 = scmp.ge.s32.totalorder %s721_s17, 2  ;;  %s724_s26 = smov 64  }
   0xc   : > { %p507_p4 = pneg %p786_p3  ;;  %s725_s27 = smov 4  }
   0xd   : > { %s444_s28 = sadd.s32 4294967294, %s721_s17   ;;  %s32_s29 = sadd.s32 1, %s717_s16 }
   0xe   : > { %p508_p5 = pnand %p507_p4, %p778_p1  ;;  %s39_s30 = sadd.s32 1, %s709_s14 }
   0xf   : > { %p34_p7 = scmp.ge.s32.totalorder %s32_s29, 2  ;;  %p46_p8 = scmp.ne.s32.totalorder %s709_s14, %s705_s13 }
  0x10   : > { %510 = dma.hbm_to_vmem [thread:$0]  (!%p508_p5), %s157_s22, 1024, %s159_s25, [#allocation6], %s724_s26, %s724_s26, %s725_s27  }
  0x11   : > { %p47_p9 = scmp.eq.s32.totalorder %s721_s17, 0  ;;  %p52_p10 = scmp.ne.s32.totalorder %s705_s13, %s701_s12 }
  0x12   : > { %s909_s29 = smov (%p34_p7, %s32_s29), 0  ;;  %p130_p13 = scmp.eq.s32.totalorder %s443_s18, 1 }
  0x13   : > { %p805_p11 = por %p47_p9, %p46_p8  ;;  %p811_p12 = por %p778_p1, %p52_p10 }
  0x14   : > { %s36_s6 = ssub.s32 %s717_s16, %s909_s29  ;;  %p136_p2 = scmp.eq.s32.totalorder %s444_s28, 1 }
  0x15   : > { %p37_p0 = scmp.eq.s32.totalorder %s36_s6, 0  ;;  %p817_p4 = por %p130_p13, %p46_p8 }
  0x16   : > { %p520_p5 = scmp.lt.s32.totalorder %s721_s17, 2  ;;  %p825_p7 = por %p136_p2, %p52_p10 }
  0x17   : > { %s823_s8 = scalar_select %p37_p0, %s709_s14, %s39_s30  }
  0x18   : > { %s178_s10 = sand.u32 1, %s709_s14   ;;  %s450_s20 = sshll.u32 %s717_s16, 2 }
  0x19   : > { %s449_s11 = sshll.u32 %s178_s10, 2  ;;  %s186_s18 = scalar_lea.hbm %s893_s0, %s450_s20 }
  0x1a   : > { %s182_s24 = scalar_lea.vmem [#allocation2], %s449_s11  ;;  %s188_s26 = sshll.u32 %s186_s18, 4  ;;  %s189_s26 = int_to_ptr.hbm [resolvable:$true] %s188_s26 }
  0x1b   : > { %s190_s25 = sshll.u32 %s182_s24, 4  ;;  %p512_p8 = pnand %p520_p5, %p805_p11  ;;  %s191_s25 = int_to_ptr.vmem [resolvable:$true] %s190_s25 }
  0x1c   : > { %s179_s27 = scalar_lea.sflag [#allocation3], %s178_s10  ;;  %199 = sbr.rel (%p786_p3) target bundleno = 202 (0xca), region = 32 }
  0x1d   : > { %514 = dma.hbm_to_vmem [thread:$0]  (!%p512_p8), %s189_s26, 64, %s191_s25, %s179_s27  }
  0x1e   : > { %s839_s28 = sand.u32 (!%p786_p3), 1, %s705_s13  }
  0x1f   : > { %s452_s30 = sshll.u32 (!%p786_p3), %s839_s28, 2  ;;  %s202_s6 = scalar_lea.sflag (!%p786_p3), [#allocation3], %s839_s28 }
  0x20   : > { %s205_s11 = scalar_lea.vmem (!%p786_p3), [#allocation2], %s452_s30 }
  0x21   : > { %688 = dma.done.wait (%p811_p12), %s202_s6, 64  }
  0x22   : > { %690 = vsyncadd (%p811_p12), %s202_s6, 4294967232 }
  0x23   : > { %692 = dma.done.wait (%p778_p1), [#allocation6], 1024  }
  0x24   : > { %694 = vsyncadd (%p778_p1), [#allocation6], 4294966272  ;;  %v498_v0 = vld [vmem:[#allocation5 + $0x38] sm:$0xff]  ;;  %v497_v1 = vld [vmem:[#allocation5 + $0x30] sm:$0xff]  ;;  %s488_s19 = sshll.u32 %s713_s15, 3  ;;  %s454_s23 = sshll.u32 %s839_s28, 3 }
  0x25   : > { %309 = vmatpush.bf16.msra.mxu0 %v498_v0  ;;  %v496_v2 = vld [vmem:[#allocation5 + $0x28] sm:$0xff]  ;;  %v495_v3 = vld [vmem:[#allocation5 + $0x20] sm:$0xff]  ;;  %v494_v4 = vld [vmem:[#allocation5 + $0x18] sm:$0xff]  ;;  %s335_s10 = scalar_lea.hbm %s896_s3, %s488_s19  ;;  %s236_s22 = scalar_lea.vmem [#allocation7], %s454_s23 }
  0x26   : > { %v493_v5 = vld [vmem:[#allocation5 + $0x10] sm:$0xff]  ;;  %v492_v6 = vld [vmem:[#allocation5 + $0x8] sm:$0xff]  ;;  %v491_v7 = vld [vmem:[#allocation5] sm:$0xff]  ;;  %s337_s18 = sshll.u32 %s236_s22, 4  ;;  %s339_s24 = sshll.u32 %s335_s10, 4  ;;  %s338_s18 = int_to_ptr.vmem [resolvable:$true] %s337_s18  ;;  %s340_s24 = int_to_ptr.hbm [resolvable:$true] %s339_s24 }
  0x27   : > { %v240_v8 = vld [vmem:[%s205_s11] sm:$0xf]  ;;  %s324_s25 = scalar_lea.sflag [#allocation4], %s839_s28  ;;  %s649_s15 = sshra.s32 %s340_s24, 4  ;;  %s650_s15 = int_to_ptr.hbm [resolvable:$true] %s649_s15 }
  0x28   : > { %v574_v9 = vld [vmem:[%s895_s2] ss:$0 sm:$0xff]  ;;  %s651_s26 = scalar_lea.hbm %s650_s15, 8  ;;  %s655_s6 = scalar_lea.hbm %s896_s3, 16 }
  0x29   : > { %310 = vmatpush.bf16.msra.mxu0 %v497_v1  ;;  %p652_p1 = scmp.ne.s32.totalorder %s650_s15, %s651_s26  ;;  %p656_p10 = scmp.lt.s32.totalorder %s650_s15, %s896_s3 }
  0x2a   : > { %p657_p11 = scmp.lt.s32.totalorder %s655_s6, %s651_s26 }
  0x2b   : > { %p653_p3 = pnand %p652_p1, %p817_p4 }
  0x2c   : > { %p658_p12 = por %p657_p11, %p656_p10 }
  0x2d   : > { %311 = vmatpush.bf16.msra.mxu0 %v496_v2  ;;  %p654_p9 = pneg %p653_p3 }
  0x2f   : > { %p659_p13 = pnand %p658_p12, %p654_p9 }
  0x31   : > { %312 = vmatpush.bf16.msra.mxu0 %v495_v3 }
  0x35   : > { %313 = vmatpush.bf16.msra.mxu0 %v494_v4 }
  0x39   : > { %314 = vmatpush.bf16.msra.mxu0 %v493_v5 }
  0x3d   : > { %315 = vmatpush.bf16.msra.mxu0 %v492_v6 }
  0x41   : > { %316 = vmatpush.bf16.msra.mxu0 %v491_v7 }
  0x44   : > { %317 = vmatmul.bf16.vlgmr.msra.gmra.mxu0 %v240_v8 }
  0xc1   : > { %v318_v10 = vpop.f32.mrf.mxu0 }
  0xc2   : > { %v319_v11 = vadd.f32 %v574_v9, %v318_v10 }
  0xc4   : > { %322 = vst [vmem:[%s236_s22] sm:$0xff] %v319_v11 }
  0xc5   : > { %662 = shalt.err (!%p659_p13)
}
  0xc6   : > { %505 = dma.vmem_to_hbm [thread:$0]  (%p817_p4), %s338_s18, 128, %s340_s24, %s324_s25  }
  0xc9   : > { %v320_v12 = vpop.f32.mrf.mxu0 }
  0xca PF: > { %s351_s28 = sand.u32 1, %s701_s12   ;;  %p516_p0 = pnand %p448_p6, %p825_p7 }
  0xcb   : > { %s352_s23 = scalar_lea.sflag [#allocation4], %s351_s28 }
  0xcc   : > { %p517_p2 = pneg %p516_p0 }
  0xce   : > { %696 = dma.done.wait (%p517_p2), %s352_s23, 128  }
  0xcf   : > { %698 = vsyncadd (%p517_p2), %s352_s23, 4294967168  ;;  %s20_s17 = sadd.s32 1, %s721_s17   ;;  %s903_s12 = smov %s705_s13 }
  0xd0   : > { %p17_p5 = scmp.ge.s32.totalorder %s20_s17, 4   ;;  %s904_s13 = smov %s709_s14 }
  0xd1   : > { %s905_s14 = smov %s823_s8  ;;  %s906_s15 = smov %s717_s16 }
  0xd2   : > { %s907_s16 = smov %s909_s29  ;;  %19 = sbr.rel (!%p17_p5) target bundleno = 7 (0x7), region = 85 }
  0xd7   :  { %358 = vsyncpa [#allocation3], 1 }
  0xd8   :  { %360 = vsyncpa [#allocation3 + $0x1], 1 }
  0xd9   :  { %361 = vsyncpa [#allocation6], 1 }
  0xda   :  { %362 = vsyncpa [#allocation4], 1 }
  0xdb   :  { %364 = vsyncpa [#allocation4 + $0x1], 1 }

</bundles_post_ra>
